<compile_context>
chip_gen: v7x
topology: tpu7x:2x2x1
jax: 0.10.0
libtpu: 0.0.40
codegen_flags: <defaults>
</compile_context>

<pallas_src>
import jax
import jax.numpy as jnp
from jax import lax
from jax.experimental import pallas as pl
from jax.experimental.pallas import tpu as pltpu

HIDDEN = 96


def _make_recurrence_kernel(t_total, tc, n_chunks):
    """h <- tanh(pre[t] + h @ W_hh^T), TC steps per grid step, tail exact."""
    rem = t_total % tc                 # static: steps in the (partial) tail chunk
    unroll_main = min(tc, 8)

    def kernel(pre_ref, whh_ref, hout_ref):
        c = pl.program_id(0)

        @pl.when(c == 0)
        def _():
            hout_ref[...] = jnp.zeros_like(hout_ref)

        whh = whh_ref[...]             # (Hp, Hp); constant index_map -> resident
        h0 = hout_ref[...]             # carry lives in the resident output block

        def step(i, h):
            # pre_ref block is (TC, Bp, Hp); pre_ref[i] is a (Bp, Hp) tile.
            return jnp.tanh(pre_ref[i] +
                            jnp.dot(h, whh, preferred_element_type=jnp.float32))

        if rem == 0:
            # All chunks are full: single unmasked loop on the critical path.
            hout_ref[...] = lax.fori_loop(0, tc, step, h0, unroll=unroll_main)
        else:
            is_tail = c == n_chunks - 1

            @pl.when(jnp.logical_not(is_tail))
            def _():
                hout_ref[...] = lax.fori_loop(0, tc, step, h0, unroll=unroll_main)

            @pl.when(is_tail)
            def _():
                # Tail chunk runs exactly `rem` steps -> no per-step mask anywhere.
                hout_ref[...] = lax.fori_loop(0, rem, step, h0,
                                              unroll=min(rem, 8))

    return kernel


def kino_rnn_forward(x_btf, w_ih, w_hh, b_ih, b_hh, w_out, b_out):
    """x_btf: (B, T, in_features)  ->  y: (B, out_features), float32."""
    B, T, F = x_btf.shape
    H = w_ih.shape[0]

    # Lane/sublane-aligned padded sizes.
    Hp = 128 * pl.cdiv(H, 128)         # 96 -> 128
    Bp = 8 * pl.cdiv(B, 8)             # 2  -> 8

    # Time chunking: TC timesteps per grid iteration.
    TC = min(T, 128)
    n_chunks = pl.cdiv(T, TC)
    Tp = n_chunks * TC

    # Pad the *small* x (F wide) before the projection so `pre` comes out
    # already padded -> no second full-size HBM copy of pre.
    x = jnp.asarray(x_btf, jnp.float32)
    x = jnp.pad(x, ((0, Bp - B), (0, Tp - T), (0, 0)))          # (Bp, Tp, F)

    wih_t = jnp.zeros((F, Hp), jnp.float32).at[:, :H].set(
        jnp.asarray(w_ih, jnp.float32).T)                       # (F, Hp)
    whh_t = jnp.zeros((Hp, Hp), jnp.float32).at[:H, :H].set(
        jnp.asarray(w_hh, jnp.float32).T)                       # (Hp, Hp)
    bias = jnp.zeros((Hp,), jnp.float32).at[:H].set(
        jnp.asarray(b_ih, jnp.float32) + jnp.asarray(b_hh, jnp.float32))

    # Hoisted input projection: one big MXU-friendly matmul, time-major output.
    # Padded timesteps contain only the bias; they are never executed (the
    # tail chunk runs exactly T % TC steps), so they cannot affect h.
    pre = jnp.einsum('btf,fh->tbh', x, wih_t) + bias            # (Tp, Bp, Hp)

    kernel = _make_recurrence_kernel(T, TC, n_chunks)

    h_last = pl.pallas_call(
        kernel,
        out_shape=jax.ShapeDtypeStruct((Bp, Hp), jnp.float32),
        grid_spec=pltpu.PrefetchScalarGridSpec(
            num_scalar_prefetch=0,
            grid=(n_chunks,),
            in_specs=[
                pl.BlockSpec((TC, Bp, Hp), lambda c: (c, 0, 0)),  # pre chunk
                pl.BlockSpec((Hp, Hp), lambda c: (0, 0)),         # W_hh^T
            ],
            out_specs=pl.BlockSpec((Bp, Hp), lambda c: (0, 0)),   # h carry / h_T
        ),
        compiler_params=pltpu.CompilerParams(
            dimension_semantics=("arbitrary",),   # sequential recurrence
            vmem_limit_bytes=32 << 20,
        ),
    )(pre, whh_t)

    # Final linear (tiny) in XLA; slice away padding.
    h_last = h_last[:B, :H]
    y = h_last @ jnp.asarray(w_out, jnp.float32).T + jnp.asarray(b_out, jnp.float32)
    return y


def _reference(x_btf, w_ih, w_hh, b_ih, b_hh, w_out, b_out):
    """Pure-JAX reference matching torch.nn.RNN(batch_first=True) + Linear."""
    B = x_btf.shape[0]
    h0 = jnp.zeros((B, HIDDEN), jnp.float32)

    def step(h, x_t):
        h_new = jnp.tanh(x_t @ w_ih.T + b_ih + h @ w_hh.T + b_hh)
        return h_new, None

    x_tbf = jnp.transpose(x_btf, (1, 0, 2))
    h_last, _ = lax.scan(step, h0, x_tbf)
    return h_last @ w_out.T + b_out


if __name__ == "__main__":
    # Small, module-consistent shapes.
    B, T = 2, 8
    in_features, out_features = 16, 4
    H = HIDDEN

    key = jax.random.PRNGKey(0)
    ks = jax.random.split(key, 7)
    s_rnn = 1.0 / jnp.sqrt(H)     # PyTorch nn.RNN default init scale
    s_lin = 1.0 / jnp.sqrt(H)     # PyTorch nn.Linear default init scale (fan_in=H)

    x = jax.random.normal(ks[0], (B, T, in_features), jnp.float32)
    w_ih = jax.random.uniform(ks[1], (H, in_features), jnp.float32, -s_rnn, s_rnn)
    w_hh = jax.random.uniform(ks[2], (H, H), jnp.float32, -s_rnn, s_rnn)
    b_ih = jax.random.uniform(ks[3], (H,), jnp.float32, -s_rnn, s_rnn)
    b_hh = jax.random.uniform(ks[4], (H,), jnp.float32, -s_rnn, s_rnn)
    w_out = jax.random.uniform(ks[5], (out_features, H), jnp.float32, -s_lin, s_lin)
    b_out = jax.random.uniform(ks[6], (out_features,), jnp.float32, -s_lin, s_lin)

    y = kino_rnn_forward(x, w_ih, w_hh, b_ih, b_hh, w_out, b_out)
    y = jax.block_until_ready(y)

    y_ref = _reference(x, w_ih, w_hh, b_ih, b_hh, w_out, b_out)
    assert y.shape == (B, out_features)
    assert jnp.allclose(y, y_ref, atol=1e-5, rtol=1e-5), "mismatch vs reference"

    print("KERNEL_OK")
</pallas_src>

<mosaic_0001>
module attributes {stable_mosaic.version = 11 : i64} {
  func.func @kernel(%arg0: i32, %arg1: memref<8x8x128xf32, #tpu.memory_space<vmem>>, %arg2: memref<128x128xf32, #tpu.memory_space<vmem>>, %arg3: memref<8x128xf32, #tpu.memory_space<vmem>>) attributes {dimension_semantics = [#tpu.dimension_semantics<arbitrary>], iteration_bounds = array<i64: 1>, scalar_prefetch = 0 : i64, scratch_operands = 0 : i64, tpu.core_type = #tpu.core_type<tc>, window_params = [{transform_indices = @transform_0, window_bounds = array<i64: 8, 8, 128>}, {pipeline_mode = #tpu.pipeline_mode<synchronous>, transform_indices = @transform_1, window_bounds = array<i64: 128, 128>}, {pipeline_mode = #tpu.pipeline_mode<synchronous>, transform_indices = @transform_2, window_bounds = array<i64: 8, 128>}]} {
    %c0_i32 = arith.constant 0 : i32
    %0 = arith.cmpi eq, %arg0, %c0_i32 : i32
    %1 = arith.extui %0 : i1 to i32
    %c0_i32_0 = arith.constant 0 : i32
    %2 = arith.cmpi ne, %1, %c0_i32_0 : i32
    scf.if %2 {
      %cst_30 = arith.constant 0.000000e+00 : f32
      %54 = vector.broadcast %cst_30 : f32 to vector<8x128xf32>
      %c0_31 = arith.constant 0 : index
      %c0_32 = arith.constant 0 : index
      %55 = vector.load %arg3[%c0_31, %c0_32] : memref<8x128xf32, #tpu.memory_space<vmem>>, vector<8x128xf32>
      tpu.vector_store %arg3[%c0_31, %c0_32], %54 {strides = array<i32>} : memref<8x128xf32, #tpu.memory_space<vmem>>, vector<8x128xf32>,
    } else {
    }
    %c0 = arith.constant 0 : index
    %c0_1 = arith.constant 0 : index
    %3 = vector.load %arg2[%c0, %c0_1] : memref<128x128xf32, #tpu.memory_space<vmem>>, vector<128x128xf32>
    %c0_2 = arith.constant 0 : index
    %c0_3 = arith.constant 0 : index
    %4 = vector.load %arg3[%c0_2, %c0_3] : memref<8x128xf32, #tpu.memory_space<vmem>>, vector<8x128xf32>
    %c0_i32_4 = arith.constant 0 : i32
    %5 = arith.index_cast %c0_i32_4 : i32 to index
    %c0_5 = arith.constant 0 : index
    %c0_6 = arith.constant 0 : index
    %6 = vector.load %arg1[%5, %c0_5, %c0_6] : memref<8x8x128xf32, #tpu.memory_space<vmem>>, vector<1x8x128xf32>
    %7 = vector.shape_cast %6 : vector<1x8x128xf32> to vector<8x128xf32>
    %cst = arith.constant dense<0.000000e+00> : vector<8x128xf32>
    %8 = tpu.matmul %4, %3, %cst {dimension_numbers = #tpu.dot_dimension_numbers<[1], [0], [0], [1], [0, 0, 1, 1], [], []>} : vector<8x128xf32>, vector<128x128xf32>, vector<8x128xf32> -> vector<8x128xf32>
    %9 = arith.addf %7, %8 : vector<8x128xf32>
    %10 = math.tanh %9 : vector<8x128xf32>
    %c1_i32 = arith.constant 1 : i32
    %11 = arith.index_cast %c1_i32 : i32 to index
    %c0_7 = arith.constant 0 : index
    %c0_8 = arith.constant 0 : index
    %12 = vector.load %arg1[%11, %c0_7, %c0_8] : memref<8x8x128xf32, #tpu.memory_space<vmem>>, vector<1x8x128xf32>
    %13 = vector.shape_cast %12 : vector<1x8x128xf32> to vector<8x128xf32>
    %cst_9 = arith.constant dense<0.000000e+00> : vector<8x128xf32>
    %14 = tpu.matmul %10, %3, %cst_9 {dimension_numbers = #tpu.dot_dimension_numbers<[1], [0], [0], [1], [0, 0, 1, 1], [], []>} : vector<8x128xf32>, vector<128x128xf32>, vector<8x128xf32> -> vector<8x128xf32>
    %15 = arith.addf %13, %14 : vector<8x128xf32>
    %16 = math.tanh %15 : vector<8x128xf32>
    %c2_i32 = arith.constant 2 : i32
    %17 = arith.index_cast %c2_i32 : i32 to index
    %c0_10 = arith.constant 0 : index
    %c0_11 = arith.constant 0 : index
    %18 = vector.load %arg1[%17, %c0_10, %c0_11] : memref<8x8x128xf32, #tpu.memory_space<vmem>>, vector<1x8x128xf32>
    %19 = vector.shape_cast %18 : vector<1x8x128xf32> to vector<8x128xf32>
    %cst_12 = arith.constant dense<0.000000e+00> : vector<8x128xf32>
    %20 = tpu.matmul %16, %3, %cst_12 {dimension_numbers = #tpu.dot_dimension_numbers<[1], [0], [0], [1], [0, 0, 1, 1], [], []>} : vector<8x128xf32>, vector<128x128xf32>, vector<8x128xf32> -> vector<8x128xf32>
    %21 = arith.addf %19, %20 : vector<8x128xf32>
    %22 = math.tanh %21 : vector<8x128xf32>
    %c3_i32 = arith.constant 3 : i32
    %23 = arith.index_cast %c3_i32 : i32 to index
    %c0_13 = arith.constant 0 : index
    %c0_14 = arith.constant 0 : index
    %24 = vector.load %arg1[%23, %c0_13, %c0_14] : memref<8x8x128xf32, #tpu.memory_space<vmem>>, vector<1x8x128xf32>
    %25 = vector.shape_cast %24 : vector<1x8x128xf32> to vector<8x128xf32>
    %cst_15 = arith.constant dense<0.000000e+00> : vector<8x128xf32>
    %26 = tpu.matmul %22, %3, %cst_15 {dimension_numbers = #tpu.dot_dimension_numbers<[1], [0], [0], [1], [0, 0, 1, 1], [], []>} : vector<8x128xf32>, vector<128x128xf32>, vector<8x128xf32> -> vector<8x128xf32>
    %27 = arith.addf %25, %26 : vector<8x128xf32>
    %28 = math.tanh %27 : vector<8x128xf32>
    %c4_i32 = arith.constant 4 : i32
    %29 = arith.index_cast %c4_i32 : i32 to index
    %c0_16 = arith.constant 0 : index
    %c0_17 = arith.constant 0 : index
    %30 = vector.load %arg1[%29, %c0_16, %c0_17] : memref<8x8x128xf32, #tpu.memory_space<vmem>>, vector<1x8x128xf32>
    %31 = vector.shape_cast %30 : vector<1x8x128xf32> to vector<8x128xf32>
    %cst_18 = arith.constant dense<0.000000e+00> : vector<8x128xf32>
    %32 = tpu.matmul %28, %3, %cst_18 {dimension_numbers = #tpu.dot_dimension_numbers<[1], [0], [0], [1], [0, 0, 1, 1], [], []>} : vector<8x128xf32>, vector<128x128xf32>, vector<8x128xf32> -> vector<8x128xf32>
    %33 = arith.addf %31, %32 : vector<8x128xf32>
    %34 = math.tanh %33 : vector<8x128xf32>
    %c5_i32 = arith.constant 5 : i32
    %35 = arith.index_cast %c5_i32 : i32 to index
    %c0_19 = arith.constant 0 : index
    %c0_20 = arith.constant 0 : index
    %36 = vector.load %arg1[%35, %c0_19, %c0_20] : memref<8x8x128xf32, #tpu.memory_space<vmem>>, vector<1x8x128xf32>
    %37 = vector.shape_cast %36 : vector<1x8x128xf32> to vector<8x128xf32>
    %cst_21 = arith.constant dense<0.000000e+00> : vector<8x128xf32>
    %38 = tpu.matmul %34, %3, %cst_21 {dimension_numbers = #tpu.dot_dimension_numbers<[1], [0], [0], [1], [0, 0, 1, 1], [], []>} : vector<8x128xf32>, vector<128x128xf32>, vector<8x128xf32> -> vector<8x128xf32>
    %39 = arith.addf %37, %38 : vector<8x128xf32>
    %40 = math.tanh %39 : vector<8x128xf32>
    %c6_i32 = arith.constant 6 : i32
    %41 = arith.index_cast %c6_i32 : i32 to index
    %c0_22 = arith.constant 0 : index
    %c0_23 = arith.constant 0 : index
    %42 = vector.load %arg1[%41, %c0_22, %c0_23] : memref<8x8x128xf32, #tpu.memory_space<vmem>>, vector<1x8x128xf32>
    %43 = vector.shape_cast %42 : vector<1x8x128xf32> to vector<8x128xf32>
    %cst_24 = arith.constant dense<0.000000e+00> : vector<8x128xf32>
    %44 = tpu.matmul %40, %3, %cst_24 {dimension_numbers = #tpu.dot_dimension_numbers<[1], [0], [0], [1], [0, 0, 1, 1], [], []>} : vector<8x128xf32>, vector<128x128xf32>, vector<8x128xf32> -> vector<8x128xf32>
    %45 = arith.addf %43, %44 : vector<8x128xf32>
    %46 = math.tanh %45 : vector<8x128xf32>
    %c7_i32 = arith.constant 7 : i32
    %47 = arith.index_cast %c7_i32 : i32 to index
    %c0_25 = arith.constant 0 : index
    %c0_26 = arith.constant 0 : index
    %48 = vector.load %arg1[%47, %c0_25, %c0_26] : memref<8x8x128xf32, #tpu.memory_space<vmem>>, vector<1x8x128xf32>
    %49 = vector.shape_cast %48 : vector<1x8x128xf32> to vector<8x128xf32>
    %cst_27 = arith.constant dense<0.000000e+00> : vector<8x128xf32>
    %50 = tpu.matmul %46, %3, %cst_27 {dimension_numbers = #tpu.dot_dimension_numbers<[1], [0], [0], [1], [0, 0, 1, 1], [], []>} : vector<8x128xf32>, vector<128x128xf32>, vector<8x128xf32> -> vector<8x128xf32>
    %51 = arith.addf %49, %50 : vector<8x128xf32>
    %52 = math.tanh %51 : vector<8x128xf32>
    %c8_i32 = arith.constant 8 : i32
    %c0_28 = arith.constant 0 : index
    %c0_29 = arith.constant 0 : index
    %53 = vector.load %arg3[%c0_28, %c0_29] : memref<8x128xf32, #tpu.memory_space<vmem>>, vector<8x128xf32>
    tpu.vector_store %arg3[%c0_28, %c0_29], %52 {strides = array<i32>} : memref<8x128xf32, #tpu.memory_space<vmem>>, vector<8x128xf32>,
    return
  }
  func.func @transform_0(%arg0: i32) -> (i32, i32, i32) {
    %c0_i32 = arith.constant 0 : i32
    %c0_i32_0 = arith.constant 0 : i32
    %c0_i32_1 = arith.constant 0 : i32
    return %arg0, %c0_i32, %c0_i32_0 : i32, i32, i32
  }
  func.func @transform_1(%arg0: i32) -> (i32, i32) {
    %c0_i32 = arith.constant 0 : i32
    %c0_i32_0 = arith.constant 0 : i32
    %c0_i32_1 = arith.constant 0 : i32
    return %c0_i32, %c0_i32_0 : i32, i32
  }
  func.func @transform_2(%arg0: i32) -> (i32, i32) {
    %c0_i32 = arith.constant 0 : i32
    %c0_i32_0 = arith.constant 0 : i32
    %c0_i32_1 = arith.constant 0 : i32
    return %c0_i32, %c0_i32_0 : i32, i32
  }
}

</mosaic_0001>

<bundles_post_ra>
// kernel: tpu_custom_call.1
= control target key start
LH: loop header
LB: loop body
LE: loop exit
PB: predicated region body
PF: predicated region fallthrough
CT: control target
= control target key end

     0   :  { %7 = vsyncpa [#allocation3], 0  ;;  %s1594_s0 = inlined_call_operand.hbm [shape: f32[8,8,128], index: 0, kind: input, shape index: {}]   ;;  %s1595_s1 = inlined_call_operand.hbm [shape: f32[128,128], index: 1, kind: input, shape index: {}]   ;;  %s1596_s2 = inlined_call_operand.hbm [shape: f32[8,128], index: 2, kind: output, shape index: {}]  }
   0x1   :  { %8 = vsyncpa [#allocation6], 0 }
   0x2   :  { %9 = vsyncpa [#allocation4], 0  ;;  %s1374_s9 = smov [#allocation2]   ;;  %s1302_s13 = scalar_lea.hbm %s1594_s0, 1024 }
   0x3   :  { %s15_s10 = sshll.u32 %s1374_s9, 4  ;;  %p1303_p0 = scmp.ne.s32.totalorder %s1594_s0, %s1302_s13  ;;  %s16_s10 = int_to_ptr.vmem [resolvable:$true] %s15_s10 }
   0x4   :  { %p1306_p1 = scmp.lt.u32.totalorder %s1302_s13, %s1594_s0 }
   0x6   :  { %p1308_p2 = pnand %p1306_p1, %p1303_p0 }
   0x8   :  { %1311 = shalt.err (!%p1308_p2)
}
   0x9   :  { %s1312_s18 = scalar_lea.vmem %s16_s10, 1024  ;;  %p1317_p4 = scmp.lt.s32.totalorder %s16_s10, %s16_s10 }
   0xa   :  { %p1313_p3 = scmp.ne.s32.totalorder %s16_s10, %s1312_s18  ;;  %p1318_p5 = scmp.lt.s32.totalorder %s1312_s18, %s1312_s18 }
   0xc   :  { %p1319_p6 = por %p1318_p5, %p1317_p4 }
   0xe   :  { %p1320_p7 = pnand %p1319_p6, %p1313_p3 }
  0x10   :  { %1323 = shalt.err (!%p1320_p7)
}
  0x11   :  { %s1375_s19 = smov 128   ;;  %s1376_s20 = smov 8  }
  0x12   :  { %21 = dma.hbm_to_vmem [thread:$0]  %s1594_s0, 1024, %s16_s10, [#allocation3], %s1375_s19, %s1375_s19, %s1376_s20  }
  0x13   :  { %s1377_s23 = smov [#allocation5]   ;;  %s1324_s27 = scalar_lea.hbm %s1595_s1, 2048 }
  0x14   :  { %s27_s24 = sshll.u32 %s1377_s23, 4  ;;  %p1325_p8 = scmp.ne.s32.totalorder %s1595_s1, %s1324_s27  ;;  %s28_s24 = int_to_ptr.vmem [resolvable:$true] %s27_s24 }
  0x15   :  { %p1328_p9 = scmp.lt.u32.totalorder %s1324_s27, %s1595_s1 }
  0x17   :  { %p1330_p10 = pnand %p1328_p9, %p1325_p8 }
  0x19   :  { %1333 = shalt.err (!%p1330_p10)
}
  0x1a   :  { %s1334_s4 = scalar_lea.vmem %s28_s24, 2048  ;;  %p1339_p12 = scmp.lt.s32.totalorder %s28_s24, %s28_s24 }
  0x1b   :  { %p1335_p11 = scmp.ne.s32.totalorder %s28_s24, %s1334_s4  ;;  %p1340_p13 = scmp.lt.s32.totalorder %s1334_s4, %s1334_s4 }
  0x1d   :  { %p1341_p0 = por %p1340_p13, %p1339_p12 }
  0x1f   :  { %p1342_p1 = pnand %p1341_p0, %p1335_p11 }
  0x21   :  { %1345 = shalt.err (!%p1342_p1)
}
  0x22   :  { %33 = dma.hbm_to_vmem [thread:$0]  %s1595_s1, 2048, %s28_s24, [#allocation6], %s1375_s19, %s1375_s19, %s1376_s20  }
  0x23   :  { %1368 = dma.done.wait [#allocation3], 1024  }
  0x24   :  { %1369 = vsyncadd [#allocation3], 4294966272 }
  0x25   :  { %1370 = dma.done.wait [#allocation6], 2048  }
  0x26   :  { %1371 = vsyncadd [#allocation6], 4294965248  ;;  %v1378_v0 = vmov 0.0|0.0   ;;  %vm1379_vm0 = vmmov 0   ;;  %v1380_v1 = vmov 0.0   ;;  %v45_v2 = vld [vmem:[#allocation5] sm:$0xff] }
  0x27   :  { %1086 = vmatprep.subr.bf16.mxu0 %v1378_v0  ;;  %838 = vmatprep.mubr.msk.f32.mxu0 %vm1379_vm0, %v1380_v1  ;;  %v46_v3 = vld [vmem:[#allocation5 + $0x8] sm:$0xff]  ;;  %v47_v4 = vld [vmem:[#allocation5 + $0x10] sm:$0xff]  ;;  %v48_v6 = vld [vmem:[#allocation5 + $0x18] sm:$0xff]  ;;  %s1381_s1 = smov [#allocation7]  }
  0x28   :  { %1110 = vmatprep.subr.bf16.mxu1 %v1378_v0  ;;  %873 = vmatprep.mubr.msk.f32.mxu1 %vm1379_vm0, %v1380_v1  ;;  %v1427_v5 = vpack.c.bf16 %v46_v3, %v45_v2  ;;  %v1430_v7 = vpack.c.bf16 %v48_v6, %v47_v4  ;;  %v49_v8 = vld [vmem:[#allocation5 + $0x20] sm:$0xff]  ;;  %v50_v9 = vld [vmem:[#allocation5 + $0x28] sm:$0xff]  ;;  %v51_v11 = vld [vmem:[#allocation5 + $0x30] sm:$0xff]  ;;  %s660_s6 = sshll.u32 %s1381_s1, 4  ;;  %s661_s6 = int_to_ptr.vmem [resolvable:$true] %s660_s6 }
  0x29   :  { %v1436_v10 = vpack.c.bf16 %v50_v9, %v49_v8  ;;  %v52_v12 = vld [vmem:[#allocation5 + $0x38] sm:$0xff]  ;;  %v53_v14 = vld [vmem:[#allocation5 + $0x40] sm:$0xff]  ;;  %v54_v15 = vld [vmem:[#allocation5 + $0x48] sm:$0xff]  ;;  %s1346_s7 = scalar_lea.vmem %s661_s6, 128  ;;  %p1351_p3 = scmp.lt.s32.totalorder %s661_s6, %s661_s6 }
  0x2a   :  { %1088 = vmatpush3.bf16.msra.mxu0 %v1427_v5  ;;  %1112 = vmatpush3.bf16.msra.mxu1 %v1427_v5  ;;  %v1442_v13 = vpack.c.bf16 %v52_v12, %v51_v11  ;;  %v1448_v16 = vpack.c.bf16 %v54_v15, %v53_v14  ;;  %v55_v17 = vld [vmem:[#allocation5 + $0x50] sm:$0xff]  ;;  %v56_v18 = vld [vmem:[#allocation5 + $0x58] sm:$0xff]  ;;  %v57_v20 = vld [vmem:[#allocation5 + $0x60] sm:$0xff]  ;;  %p1347_p2 = scmp.ne.s32.totalorder %s661_s6, %s1346_s7  ;;  %p1352_p4 = scmp.lt.s32.totalorder %s1346_s7, %s1346_s7 }
  0x2b   :  { %1089 = vmatprep.subr.bf16.mxu0 %v1378_v0  ;;  %1113 = vmatprep.subr.bf16.mxu1 %v1378_v0  ;;  %v1454_v19 = vpack.c.bf16 %v56_v18, %v55_v17  ;;  %v58_v21 = vld [vmem:[#allocation5 + $0x68] sm:$0xff]  ;;  %v59_v23 = vld [vmem:[#allocation5 + $0x70] sm:$0xff]  ;;  %v60_v24 = vld [vmem:[#allocation5 + $0x78] sm:$0xff] }
  0x2c   :  { %v1460_v22 = vpack.c.bf16 %v58_v21, %v57_v20  ;;  %v1466_v25 = vpack.c.bf16 %v60_v24, %v59_v23  ;;  %v62_v26 = vld [vmem:[#allocation2] sm:$0xff]  ;;  %v136_v31 = vld [vmem:[#allocation2 + $0x8] sm:$0xff]  ;;  %v210_v36 = vld [vmem:[#allocation2 + $0x10] sm:$0xff]  ;;  %p1353_p5 = por %p1352_p4, %p1351_p3 }
  0x2d   :  { %v284_v41 = vld [vmem:[#allocation2 + $0x18] sm:$0xff]  ;;  %v358_v46 = vld [vmem:[#allocation2 + $0x20] sm:$0xff]  ;;  %v432_v51 = vld [vmem:[#allocation2 + $0x28] sm:$0xff] }
  0x2e   :  { %1091 = vmatpush3.bf16.msra.mxu0 %v1430_v7  ;;  %1115 = vmatpush3.bf16.msra.mxu1 %v1430_v7  ;;  %v506_v56 = vld [vmem:[#allocation2 + $0x30] sm:$0xff]  ;;  %v580_v61 = vld [vmem:[#allocation2 + $0x38] sm:$0xff]  ;;  %p1354_p6 = pnand %p1353_p5, %p1347_p2 }
  0x2f   :  { %1092 = vmatprep.subr.bf16.mxu0 %v1378_v0  ;;  %1116 = vmatprep.subr.bf16.mxu1 %v1378_v0 }
  0x32   :  { %1094 = vmatpush3.bf16.msra.mxu0 %v1436_v10  ;;  %1118 = vmatpush3.bf16.msra.mxu1 %v1436_v10 }
  0x33   :  { %1095 = vmatprep.subr.bf16.mxu0 %v1378_v0  ;;  %1119 = vmatprep.subr.bf16.mxu1 %v1378_v0 }
  0x36   :  { %1097 = vmatpush3.bf16.msra.mxu0 %v1442_v13  ;;  %1121 = vmatpush3.bf16.msra.mxu1 %v1442_v13 }
  0x37   :  { %1098 = vmatprep.subr.bf16.mxu0 %v1378_v0  ;;  %1122 = vmatprep.subr.bf16.mxu1 %v1378_v0 }
  0x3a   :  { %1100 = vmatpush3.bf16.msra.mxu0 %v1448_v16  ;;  %1124 = vmatpush3.bf16.msra.mxu1 %v1448_v16 }
  0x3b   :  { %1101 = vmatprep.subr.bf16.mxu0 %v1378_v0  ;;  %1125 = vmatprep.subr.bf16.mxu1 %v1378_v0 }
  0x3e   :  { %1103 = vmatpush3.bf16.msra.mxu0 %v1454_v19  ;;  %1127 = vmatpush3.bf16.msra.mxu1 %v1454_v19 }
  0x3f   :  { %1104 = vmatprep.subr.bf16.mxu0 %v1378_v0  ;;  %1128 = vmatprep.subr.bf16.mxu1 %v1378_v0 }
  0x42   :  { %1106 = vmatpush3.bf16.msra.mxu0 %v1460_v22  ;;  %1130 = vmatpush3.bf16.msra.mxu1 %v1460_v22 }
  0x43   :  { %1107 = vmatprep.subr.bf16.mxu0 %v1378_v0  ;;  %1131 = vmatprep.subr.bf16.mxu1 %v1378_v0 }
  0x46   :  { %1109 = vmatpush3.bf16.msra.mxu0 %v1466_v25  ;;  %1133 = vmatpush3.bf16.msra.mxu1 %v1466_v25 }
  0x47   :  { %1134 = vmatprep.subr.bf16.mxu0 %v1378_v0  ;;  %1158 = vmatprep.subr.bf16.mxu1 %v1378_v0 }
  0x49   :  { %839 = vmatmul.mubr.f32.vlgmr.msra.gmra.mrb[0].mxu0 %v1380_v1 }
  0x4a   :  { %1136 = vmatpush3.bf16.msra.mxu0 %v1427_v5  ;;  %908 = vmatprep.mubr.msk.f32.mxu0 %vm1379_vm0, %v1380_v1 }
  0x4b   :  { %1137 = vmatprep.subr.bf16.mxu0 %v1378_v0 }
  0x4e   :  { %1139 = vmatpush3.bf16.msra.mxu0 %v1430_v7 }
  0x4f   :  { %1140 = vmatprep.subr.bf16.mxu0 %v1378_v0 }
  0x52   :  { %1142 = vmatpush3.bf16.msra.mxu0 %v1436_v10 }
  0x53   :  { %1143 = vmatprep.subr.bf16.mxu0 %v1378_v0 }
  0x56   :  { %1145 = vmatpush3.bf16.msra.mxu0 %v1442_v13 }
  0x57   :  { %1146 = vmatprep.subr.bf16.mxu0 %v1378_v0 }
  0x5a   :  { %1148 = vmatpush3.bf16.msra.mxu0 %v1448_v16 }
  0x5b   :  { %1149 = vmatprep.subr.bf16.mxu0 %v1378_v0 }
  0x5e   :  { %1151 = vmatpush3.bf16.msra.mxu0 %v1454_v19 }
  0x5f   :  { %1152 = vmatprep.subr.bf16.mxu0 %v1378_v0 }
  0x62   :  { %1154 = vmatpush3.bf16.msra.mxu0 %v1460_v22 }
  0x63   :  { %1155 = vmatprep.subr.bf16.mxu0 %v1378_v0 }
  0x66   :  { %1157 = vmatpush3.bf16.msra.mxu0 %v1466_v25 }
  0x67   :  { %1182 = vmatprep.subr.bf16.mxu0 %v1378_v0 }
 0x11c   :  { %v129_v27 = vpop.f32.mrb[0].mxu0 }
 0x11d   :  { %v133_v28 = vadd.f32 %v129_v27, %v62_v26  ;;  %v840_v29 = vpop.f32.mrb[1].mxu0 }
 0x11f   :  { %1286 = vtanh.f32 %v133_v28 }
 0x129   :  { %v1287_v30 = vpop.eup %1286 }
 0x12a   :  { %874 = vmatmul.mubr.f32.vlgmr.msra.gmra.mrb[0].mxu1 %v1287_v30 }
 0x12b   :  { %1160 = vmatpush3.bf16.msra.mxu1 %v1427_v5  ;;  %943 = vmatprep.mubr.msk.f32.mxu1 %vm1379_vm0, %v1380_v1 }
 0x12c   :  { %1161 = vmatprep.subr.bf16.mxu1 %v1378_v0 }
 0x12f   :  { %1163 = vmatpush3.bf16.msra.mxu1 %v1430_v7 }
 0x130   :  { %1164 = vmatprep.subr.bf16.mxu1 %v1378_v0 }
 0x133   :  { %1166 = vmatpush3.bf16.msra.mxu1 %v1436_v10 }
 0x134   :  { %1167 = vmatprep.subr.bf16.mxu1 %v1378_v0 }
 0x137   :  { %1169 = vmatpush3.bf16.msra.mxu1 %v1442_v13 }
 0x138   :  { %1170 = vmatprep.subr.bf16.mxu1 %v1378_v0 }
 0x13b   :  { %1172 = vmatpush3.bf16.msra.mxu1 %v1448_v16 }
 0x13c   :  { %1173 = vmatprep.subr.bf16.mxu1 %v1378_v0 }
 0x13f   :  { %1175 = vmatpush3.bf16.msra.mxu1 %v1454_v19 }
 0x140   :  { %1176 = vmatprep.subr.bf16.mxu1 %v1378_v0 }
 0x143   :  { %1178 = vmatpush3.bf16.msra.mxu1 %v1460_v22 }
 0x144   :  { %1179 = vmatprep.subr.bf16.mxu1 %v1378_v0 }
 0x147   :  { %1181 = vmatpush3.bf16.msra.mxu1 %v1466_v25 }
 0x148   :  { %1206 = vmatprep.subr.bf16.mxu1 %v1378_v0 }
 0x1fd   :  { %v203_v32 = vpop.f32.mrb[0].mxu1 }
 0x1fe   :  { %v207_v33 = vadd.f32 %v203_v32, %v136_v31  ;;  %v875_v34 = vpop.f32.mrb[1].mxu1 }
 0x200   :  { %1288 = vtanh.f32 %v207_v33 }
 0x20a   :  { %v1289_v35 = vpop.eup %1288 }
 0x20b   :  { %909 = vmatmul.mubr.f32.vlgmr.msra.gmra.mrb[2].mxu0 %v1289_v35 }
 0x20c   :  { %1184 = vmatpush3.bf16.msra.mxu0 %v1427_v5  ;;  %978 = vmatprep.mubr.msk.f32.mxu0 %vm1379_vm0, %v1380_v1 }
 0x20d   :  { %1185 = vmatprep.subr.bf16.mxu0 %v1378_v0 }
 0x210   :  { %1187 = vmatpush3.bf16.msra.mxu0 %v1430_v7 }
 0x211   :  { %1188 = vmatprep.subr.bf16.mxu0 %v1378_v0 }
 0x214   :  { %1190 = vmatpush3.bf16.msra.mxu0 %v1436_v10 }
 0x215   :  { %1191 = vmatprep.subr.bf16.mxu0 %v1378_v0 }
 0x218   :  { %1193 = vmatpush3.bf16.msra.mxu0 %v1442_v13 }
 0x219   :  { %1194 = vmatprep.subr.bf16.mxu0 %v1378_v0 }
 0x21c   :  { %1196 = vmatpush3.bf16.msra.mxu0 %v1448_v16 }
 0x21d   :  { %1197 = vmatprep.subr.bf16.mxu0 %v1378_v0 }
 0x220   :  { %1199 = vmatpush3.bf16.msra.mxu0 %v1454_v19 }
 0x221   :  { %1200 = vmatprep.subr.bf16.mxu0 %v1378_v0 }
 0x224   :  { %1202 = vmatpush3.bf16.msra.mxu0 %v1460_v22 }
 0x225   :  { %1203 = vmatprep.subr.bf16.mxu0 %v1378_v0 }
 0x228   :  { %1205 = vmatpush3.bf16.msra.mxu0 %v1466_v25 }
 0x229   :  { %1230 = vmatprep.subr.bf16.mxu0 %v1378_v0 }
 0x2de   :  { %v277_v37 = vpop.f32.mrb[2].mxu0 }
 0x2df   :  { %v281_v38 = vadd.f32 %v277_v37, %v210_v36  ;;  %v910_v39 = vpop.f32.mrb[3].mxu0 }
 0x2e1   :  { %1290 = vtanh.f32 %v281_v38 }
 0x2eb   :  { %v1291_v40 = vpop.eup %1290 }
 0x2ec   :  { %944 = vmatmul.mubr.f32.vlgmr.msra.gmra.mrb[2].mxu1 %v1291_v40 }
 0x2ed   :  { %1208 = vmatpush3.bf16.msra.mxu1 %v1427_v5  ;;  %1013 = vmatprep.mubr.msk.f32.mxu1 %vm1379_vm0, %v1380_v1 }
 0x2ee   :  { %1209 = vmatprep.subr.bf16.mxu1 %v1378_v0 }
 0x2f1   :  { %1211 = vmatpush3.bf16.msra.mxu1 %v1430_v7 }
 0x2f2   :  { %1212 = vmatprep.subr.bf16.mxu1 %v1378_v0 }
 0x2f5   :  { %1214 = vmatpush3.bf16.msra.mxu1 %v1436_v10 }
 0x2f6   :  { %1215 = vmatprep.subr.bf16.mxu1 %v1378_v0 }
 0x2f9   :  { %1217 = vmatpush3.bf16.msra.mxu1 %v1442_v13 }
 0x2fa   :  { %1218 = vmatprep.subr.bf16.mxu1 %v1378_v0 }
 0x2fd   :  { %1220 = vmatpush3.bf16.msra.mxu1 %v1448_v16 }
 0x2fe   :  { %1221 = vmatprep.subr.bf16.mxu1 %v1378_v0 }
 0x301   :  { %1223 = vmatpush3.bf16.msra.mxu1 %v1454_v19 }
 0x302   :  { %1224 = vmatprep.subr.bf16.mxu1 %v1378_v0 }
 0x305   :  { %1226 = vmatpush3.bf16.msra.mxu1 %v1460_v22 }
 0x306   :  { %1227 = vmatprep.subr.bf16.mxu1 %v1378_v0 }
 0x309   :  { %1229 = vmatpush3.bf16.msra.mxu1 %v1466_v25 }
 0x30a   :  { %1254 = vmatprep.subr.bf16.mxu1 %v1378_v0 }
 0x3bf   :  { %v351_v42 = vpop.f32.mrb[2].mxu1 }
 0x3c0   :  { %v355_v43 = vadd.f32 %v351_v42, %v284_v41  ;;  %v945_v44 = vpop.f32.mrb[3].mxu1 }
 0x3c2   :  { %1292 = vtanh.f32 %v355_v43 }
 0x3cc   :  { %v1293_v45 = vpop.eup %1292 }
 0x3cd   :  { %979 = vmatmul.mubr.f32.vlgmr.msra.gmra.mrb[4].mxu0 %v1293_v45 }
 0x3ce   :  { %1232 = vmatpush3.bf16.msra.mxu0 %v1427_v5  ;;  %1048 = vmatprep.mubr.msk.f32.mxu0 %vm1379_vm0, %v1380_v1 }
 0x3cf   :  { %1233 = vmatprep.subr.bf16.mxu0 %v1378_v0 }
 0x3d2   :  { %1235 = vmatpush3.bf16.msra.mxu0 %v1430_v7 }
 0x3d3   :  { %1236 = vmatprep.subr.bf16.mxu0 %v1378_v0 }
 0x3d6   :  { %1238 = vmatpush3.bf16.msra.mxu0 %v1436_v10 }
 0x3d7   :  { %1239 = vmatprep.subr.bf16.mxu0 %v1378_v0 }
 0x3da   :  { %1241 = vmatpush3.bf16.msra.mxu0 %v1442_v13 }
 0x3db   :  { %1242 = vmatprep.subr.bf16.mxu0 %v1378_v0 }
 0x3de   :  { %1244 = vmatpush3.bf16.msra.mxu0 %v1448_v16 }
 0x3df   :  { %1245 = vmatprep.subr.bf16.mxu0 %v1378_v0 }
 0x3e2   :  { %1247 = vmatpush3.bf16.msra.mxu0 %v1454_v19 }
 0x3e3   :  { %1248 = vmatprep.subr.bf16.mxu0 %v1378_v0 }
 0x3e6   :  { %1250 = vmatpush3.bf16.msra.mxu0 %v1460_v22 }
 0x3e7   :  { %1251 = vmatprep.subr.bf16.mxu0 %v1378_v0 }
 0x3ea   :  { %1253 = vmatpush3.bf16.msra.mxu0 %v1466_v25 }
 0x4a0   :  { %v425_v47 = vpop.f32.mrb[4].mxu0 }
 0x4a1   :  { %v429_v48 = vadd.f32 %v425_v47, %v358_v46  ;;  %v980_v49 = vpop.f32.mrb[5].mxu0 }
 0x4a3   :  { %1294 = vtanh.f32 %v429_v48 }
 0x4ad   :  { %v1295_v50 = vpop.eup %1294 }
 0x4ae   :  { %1014 = vmatmul.mubr.f32.vlgmr.msra.gmra.mrb[4].mxu1 %v1295_v50 }
 0x4af   :  { %1256 = vmatpush3.bf16.msra.mxu1 %v1427_v5  ;;  %1083 = vmatprep.mubr.msk.f32.mxu1 %vm1379_vm0, %v1380_v1 }
 0x4b0   :  { %1257 = vmatprep.subr.bf16.mxu1 %v1378_v0 }
 0x4b3   :  { %1259 = vmatpush3.bf16.msra.mxu1 %v1430_v7 }
 0x4b4   :  { %1260 = vmatprep.subr.bf16.mxu1 %v1378_v0 }
 0x4b7   :  { %1262 = vmatpush3.bf16.msra.mxu1 %v1436_v10 }
 0x4b8   :  { %1263 = vmatprep.subr.bf16.mxu1 %v1378_v0 }
 0x4bb   :  { %1265 = vmatpush3.bf16.msra.mxu1 %v1442_v13 }
 0x4bc   :  { %1266 = vmatprep.subr.bf16.mxu1 %v1378_v0 }
 0x4bf   :  { %1268 = vmatpush3.bf16.msra.mxu1 %v1448_v16 }
 0x4c0   :  { %1269 = vmatprep.subr.bf16.mxu1 %v1378_v0 }
 0x4c3   :  { %1271 = vmatpush3.bf16.msra.mxu1 %v1454_v19 }
 0x4c4   :  { %1272 = vmatprep.subr.bf16.mxu1 %v1378_v0 }
 0x4c7   :  { %1274 = vmatpush3.bf16.msra.mxu1 %v1460_v22 }
 0x4c8   :  { %1275 = vmatprep.subr.bf16.mxu1 %v1378_v0 }
 0x4cb   :  { %1277 = vmatpush3.bf16.msra.mxu1 %v1466_v25 }
 0x581   :  { %v499_v52 = vpop.f32.mrb[4].mxu1 }
 0x582   :  { %v503_v53 = vadd.f32 %v499_v52, %v432_v51  ;;  %v1015_v54 = vpop.f32.mrb[5].mxu1 }
 0x584   :  { %1296 = vtanh.f32 %v503_v53 }
 0x58e   :  { %v1297_v55 = vpop.eup %1296 }
 0x58f   :  { %1049 = vmatmul.mubr.f32.vlgmr.msra.gmra.mrb[6].mxu0 %v1297_v55 }
 0x662   :  { %v573_v57 = vpop.f32.mrb[6].mxu0 }
 0x663   :  { %v577_v58 = vadd.f32 %v573_v57, %v506_v56  ;;  %v1050_v59 = vpop.f32.mrb[7].mxu0 }
 0x665   :  { %1298 = vtanh.f32 %v577_v58 }
 0x66f   :  { %v1299_v60 = vpop.eup %1298 }
 0x670   :  { %1084 = vmatmul.mubr.f32.vlgmr.msra.gmra.mrb[6].mxu1 %v1299_v60 }
 0x743   :  { %v647_v62 = vpop.f32.mrb[6].mxu1 }
 0x744   :  { %v651_v63 = vadd.f32 %v647_v62, %v580_v61  ;;  %v1085_v0 = vpop.f32.mrb[7].mxu1 }
 0x746   :  { %1300 = vtanh.f32 %v651_v63 }
 0x750   :  { %v1301_v1 = vpop.eup %1300 }
 0x751   :  { %653 = vst [vmem:[#allocation7] sm:$0xff] %v1301_v1 }
 0x752   :  { %1357 = shalt.err (!%p1354_p6)
}
 0x753   :  { %s1358_s10 = scalar_lea.hbm %s1596_s2, 128 }
 0x754   :  { %p1359_p7 = scmp.ne.s32.totalorder %s1596_s2, %s1358_s10  ;;  %p1362_p8 = scmp.lt.u32.totalorder %s1358_s10, %s1596_s2 }
 0x756   :  { %p1364_p9 = pnand %p1362_p8, %p1359_p7 }
 0x758   :  { %1367 = shalt.err (!%p1364_p9)
}
 0x759   :  { %663 = dma.vmem_to_hbm [thread:$0]  %s661_s6, 128, %s1596_s2, [#allocation4]  }
 0x75a   :  { %1372 = dma.done.wait [#allocation4], 128  }
 0x75b   :  { %1373 = vsyncadd [#allocation4], 4294967168 }
 0x75c   :  { %667 = vsyncpa [#allocation3], 1 }
 0x75d   :  { %668 = vsyncpa [#allocation6], 1 }
 0x75e   :  { %669 = vsyncpa [#allocation4], 1 }

</bundles_post_ra>
